<compile_context>
chip_gen: v6e
topology: v6e:2x2x1
jax: 0.10.0
libtpu: 0.0.40
codegen_flags: <defaults>
</compile_context>

<pallas_src>
import jax
import jax.numpy as jnp
from jax import lax
from jax.experimental import pallas as pl
from jax.experimental.pallas import tpu as pltpu


def _round_up(x, m):
    return (x + m - 1) // m * m


# Candidate tile sizes (descending). Rows align to 8 sublanes, cols to 128
# lanes (lane-dense output -> unmasked vst).
_TQ_CANDIDATES = (512, 256, 128, 64, 32, 16, 8)
_TN_CANDIDATES = (512, 256, 128)


def _pick_tile(n, candidates):
    """Largest candidate tile whose padding stays within ~12.5% of the minimum
    achievable padded extent (minimum = rounding up to the smallest candidate).
    Returns (tile, padded_extent)."""
    min_pad = _round_up(n, candidates[-1])
    budget = min_pad + min_pad // 8
    for t in candidates:
        padded = _round_up(n, t)
        if padded <= budget:
            return t, padded
    return candidates[-1], min_pad


def _nce_kernel(scale_ref, q_ref, p_ref, qsq_ref, psq_ref, out_ref):
    # scale_ref: SMEM (1, 1)  f32  -> -1/temperature (sign folded in)
    # q_ref:     VMEM (TQ, D)      query tile
    # p_ref:     VMEM (TN, D)      prototype tile
    # qsq_ref:   VMEM (TQ, 1)      precomputed ||q||^2 (hoisted out of grid)
    # psq_ref:   VMEM (1, TN)      precomputed ||p||^2 (hoisted out of grid)
    # out_ref:   VMEM (TQ, TN)     scores tile (TN multiple of 128 -> lane-dense)

    # q @ p^T as a direct contraction over the feature dim: MXU matmul with no
    # materialized transpose of the prototype tile.
    qp = lax.dot_general(q_ref[...], p_ref[...], (((1,), (1,)), ((), ())),
                         preferred_element_type=jnp.float32)          # (TQ, TN)

    # ||p - q||^2 = ||q||^2 + ||p||^2 - 2 q.p ; clamp tiny negatives from
    # catastrophic cancellation so scores stay <= 0 like the true distance.
    d2 = jnp.maximum(qsq_ref[...] + psq_ref[...] - 2.0 * qp, 0.0)     # (TQ, TN)

    out_ref[...] = d2 * scale_ref[0, 0]                               # * (-1/T)


def nce_classifier(x, num_batch, temperature, *, tq=None, tn=None):
    """scores[i, j] = -||proto_j - query_i||^2 / temperature."""
    query = x[:num_batch]
    proto = x[num_batch:]
    if query.dtype != jnp.float32:
        query = query.astype(jnp.float32)
        proto = proto.astype(jnp.float32)
    nq, d = query.shape
    np_, _ = proto.shape

    # Tile sizes: near-minimal padding, MXU/lane aligned.
    if tq is None:
        tq, nq_pad = _pick_tile(nq, _TQ_CANDIDATES)
    else:
        nq_pad = _round_up(nq, tq)
    if tn is None:
        tn, np_pad = _pick_tile(np_, _TN_CANDIDATES)
    else:
        np_pad = _round_up(np_, tn)

    # v7x has 2 TensorCores: split a would-be (1, 1) grid along the lane-dense
    # j axis so both cores get a program (np_pad stays a multiple of tn).
    if (nq_pad // tq) * (np_pad // tn) == 1 and tn > 128:
        tn //= 2

    # TODO(synk): add a K ("arbitrary") grid axis over D with an f32 VMEM
    # accumulator (and optionally bf16 matmul inputs) once tq*D + tn*D tiles
    # stress the v7x 64 MiB / v5e 16 MiB scoped VMEM budgets (D >= ~2-4K).

    # Row-wise norms hoisted out of the grid loop, computed on un-padded data.
    q_sq = jnp.sum(query * query, axis=-1)                            # (nq,)
    p_sq = jnp.sum(proto * proto, axis=-1)                            # (np_,)

    # Pad only row extents; the feature dim D stays un-padded (BlockSpec last
    # dims equal the full array extent, Mosaic handles the ragged contraction).
    if nq_pad != nq:
        query = jnp.pad(query, ((0, nq_pad - nq), (0, 0)))
        q_sq = jnp.pad(q_sq, (0, nq_pad - nq))
    if np_pad != np_:
        proto = jnp.pad(proto, ((0, np_pad - np_), (0, 0)))
        p_sq = jnp.pad(p_sq, (0, np_pad - np_))
    q_sq = q_sq[:, None]                                              # (nq_pad, 1)
    p_sq = p_sq[None, :]                                              # (1, np_pad)

    # Fold sign + temperature into a single scalar.
    scale = (-1.0 / jnp.asarray(temperature, jnp.float32)).reshape(1, 1)

    grid = (nq_pad // tq, np_pad // tn)

    # VMEM budget: double-buffered q/p/norm/out tiles + 1 MiB headroom,
    # clamped to v7x's 64 MiB physical per-TC VMEM.
    tile_bytes = 2 * (tq * d + tn * d + tq * tn + tq + tn) * 4
    vmem_limit = int(min(64 << 20, max(tile_bytes + (1 << 20), 16 << 20)))

    out = pl.pallas_call(
        _nce_kernel,
        out_shape=jax.ShapeDtypeStruct((nq_pad, np_pad), jnp.float32),
        grid_spec=pltpu.PrefetchScalarGridSpec(
            num_scalar_prefetch=0,
            grid=grid,
            in_specs=[
                pl.BlockSpec(memory_space=pltpu.MemorySpace.SMEM),    # -1/T scalar
                pl.BlockSpec((tq, d), lambda i, j: (i, 0)),           # query tile
                pl.BlockSpec((tn, d), lambda i, j: (j, 0)),           # proto tile
                pl.BlockSpec((tq, 1), lambda i, j: (i, 0)),           # ||q||^2 tile
                pl.BlockSpec((1, tn), lambda i, j: (0, j)),           # ||p||^2 tile
            ],
            out_specs=pl.BlockSpec((tq, tn), lambda i, j: (i, j)),
        ),
        compiler_params=pltpu.CompilerParams(
            dimension_semantics=("parallel", "parallel"),
            vmem_limit_bytes=vmem_limit,
        ),
    )(scale, query, proto, q_sq, p_sq)

    return out[:nq, :np_]


def nce_classifier_ref(x, num_batch, temperature):
    query = x[:num_batch]
    proto = x[num_batch:]
    diff = proto[None, :, :] - query[:, None, :]
    return -jnp.sum(diff * diff, axis=2) / temperature


if __name__ == "__main__":
    temperature = 64.0  # matches nn.Parameter(torch.tensor(64.0)) init
    key = jax.random.PRNGKey(0)
    k1, k2 = jax.random.split(key)

    # Case 1: shapes consistent with the module's typical forward
    #         (num_batch queries, args.base_class prototypes, 128-d features).
    num_batch, num_proto, feat_dim = 8, 16, 128
    x = jax.random.normal(k1, (num_batch + num_proto, feat_dim), jnp.float32)
    scores = jax.block_until_ready(nce_classifier(x, num_batch, temperature))
    ref = nce_classifier_ref(x, num_batch, temperature)
    assert scores.shape == (num_batch, num_proto)
    assert jnp.allclose(scores, ref, atol=1e-3, rtol=1e-3), "mismatch (case 1)"

    # Case 2: ragged shapes (non-multiple-of-128 D, ragged NQ/NP) exercising
    #         the un-padded-D path and row/col padding + tiling.
    num_batch, num_proto, feat_dim = 24, 40, 160
    x2 = jax.random.normal(k2, (num_batch + num_proto, feat_dim), jnp.float32)
    scores2 = jax.block_until_ready(nce_classifier(x2, num_batch, temperature))
    ref2 = nce_classifier_ref(x2, num_batch, temperature)
    assert scores2.shape == (num_batch, num_proto)
    assert jnp.allclose(scores2, ref2, atol=1e-3, rtol=1e-3), "mismatch (case 2)"

    print("KERNEL_OK")
</pallas_src>

<mosaic_0001>
module attributes {stable_mosaic.version = 11 : i64} {
  func.func @_nce_kernel(%arg0: i32, %arg1: i32, %arg2: memref<1x1xf32, #tpu.memory_space<smem>>, %arg3: memref<8x128xf32, #tpu.memory_space<vmem>>, %arg4: memref<128x128xf32, #tpu.memory_space<vmem>>, %arg5: memref<8x1xf32, #tpu.memory_space<vmem>>, %arg6: memref<1x128xf32, #tpu.memory_space<vmem>>, %arg7: memref<8x128xf32, #tpu.memory_space<vmem>>) attributes {dimension_semantics = [#tpu.dimension_semantics<parallel>, #tpu.dimension_semantics<parallel>], iteration_bounds = array<i64: 1, 1>, scalar_prefetch = 0 : i64, scratch_operands = 0 : i64, tpu.core_type = #tpu.core_type<tc>, window_params = [{transform_indices = @transform_0, window_bounds = array<i64: 1, 1>}, {transform_indices = @transform_1, window_bounds = array<i64: 8, 128>}, {transform_indices = @transform_2, window_bounds = array<i64: 128, 128>}, {transform_indices = @transform_3, window_bounds = array<i64: 8, 1>}, {transform_indices = @transform_4, window_bounds = array<i64: 1, 128>}, {transform_indices = @transform_5, window_bounds = array<i64: 8, 128>}]} {
    %c0 = arith.constant 0 : index
    %c0_0 = arith.constant 0 : index
    %0 = vector.load %arg3[%c0, %c0_0] : memref<8x128xf32, #tpu.memory_space<vmem>>, vector<8x128xf32>
    %c0_1 = arith.constant 0 : index
    %c0_2 = arith.constant 0 : index
    %1 = vector.load %arg4[%c0_1, %c0_2] : memref<128x128xf32, #tpu.memory_space<vmem>>, vector<128x128xf32>
    %cst = arith.constant dense<0.000000e+00> : vector<8x128xf32>
    %2 = tpu.matmul %0, %1, %cst {dimension_numbers = #tpu.dot_dimension_numbers<[1], [1], [0], [0], [0, 0, 1, 0], [], []>} : vector<8x128xf32>, vector<128x128xf32>, vector<8x128xf32> -> vector<8x128xf32>
    %c0_3 = arith.constant 0 : index
    %c0_4 = arith.constant 0 : index
    %3 = vector.load %arg5[%c0_3, %c0_4] : memref<8x1xf32, #tpu.memory_space<vmem>>, vector<8x1xf32>
    %c0_5 = arith.constant 0 : index
    %c0_6 = arith.constant 0 : index
    %4 = vector.load %arg6[%c0_5, %c0_6] : memref<1x128xf32, #tpu.memory_space<vmem>>, vector<1x128xf32>
    %5 = vector.broadcast %3 : vector<8x1xf32> to vector<8x128xf32>
    %6 = vector.broadcast %4 : vector<1x128xf32> to vector<8x128xf32>
    %7 = arith.addf %5, %6 : vector<8x128xf32>
    %cst_7 = arith.constant 2.000000e+00 : f32
    %8 = vector.broadcast %cst_7 : f32 to vector<8x128xf32>
    %9 = arith.mulf %8, %2 : vector<8x128xf32>
    %10 = arith.subf %7, %9 : vector<8x128xf32>
    %cst_8 = arith.constant 0.000000e+00 : f32
    %11 = vector.broadcast %cst_8 : f32 to vector<8x128xf32>
    %12 = arith.maximumf %10, %11 : vector<8x128xf32>
    %c0_9 = arith.constant 0 : index
    %c0_10 = arith.constant 0 : index
    %13 = memref.load %arg2[%c0_9, %c0_10] : memref<1x1xf32, #tpu.memory_space<smem>>
    %14 = vector.broadcast %13 : f32 to vector<8x128xf32>
    %15 = arith.mulf %12, %14 : vector<8x128xf32>
    %c0_11 = arith.constant 0 : index
    %c0_12 = arith.constant 0 : index
    %16 = vector.load %arg7[%c0_11, %c0_12] : memref<8x128xf32, #tpu.memory_space<vmem>>, vector<8x128xf32>
    tpu.vector_store %arg7[%c0_11, %c0_12], %15 {strides = array<i32>} : memref<8x128xf32, #tpu.memory_space<vmem>>, vector<8x128xf32>,
    return
  }
  func.func @transform_0(%arg0: i32, %arg1: i32) -> (i32, i32) {
    %c0_i32 = arith.constant 0 : i32
    %c0_i32_0 = arith.constant 0 : i32
    %c0_i32_1 = arith.constant 0 : i32
    return %c0_i32, %c0_i32_0 : i32, i32
  }
  func.func @transform_1(%arg0: i32, %arg1: i32) -> (i32, i32) {
    %c0_i32 = arith.constant 0 : i32
    %c0_i32_0 = arith.constant 0 : i32
    return %arg0, %c0_i32 : i32, i32
  }
  func.func @transform_2(%arg0: i32, %arg1: i32) -> (i32, i32) {
    %c0_i32 = arith.constant 0 : i32
    %c0_i32_0 = arith.constant 0 : i32
    return %arg1, %c0_i32 : i32, i32
  }
  func.func @transform_3(%arg0: i32, %arg1: i32) -> (i32, i32) {
    %c0_i32 = arith.constant 0 : i32
    %c0_i32_0 = arith.constant 0 : i32
    return %arg0, %c0_i32 : i32, i32
  }
  func.func @transform_4(%arg0: i32, %arg1: i32) -> (i32, i32) {
    %c0_i32 = arith.constant 0 : i32
    %c0_i32_0 = arith.constant 0 : i32
    return %c0_i32, %arg1 : i32, i32
  }
  func.func @transform_5(%arg0: i32, %arg1: i32) -> (i32, i32) {
    %c0_i32 = arith.constant 0 : i32
    return %arg0, %arg1 : i32, i32
  }
}

</mosaic_0001>

<bundles_post_ra>
// kernel: tpu_custom_call.1
= control target key start
LH: loop header
LB: loop body
LE: loop exit
PB: predicated region body
PF: predicated region fallthrough
CT: control target
= control target key end

     0   :  { %11 = vsyncpa [#allocation4], 0  ;;  %s319_s0 = inlined_call_operand.<no memory space> [shape: f32[1,1], index: 0, kind: input, shape index: {}]   ;;  %s320_s1 = inlined_call_operand.vmem [shape: f32[8,128], index: 1, kind: input, shape index: {}]   ;;  %s321_s2 = inlined_call_operand.hbm [shape: f32[128,128], index: 2, kind: input, shape index: {}]   ;;  %s322_s3 = inlined_call_operand.vmem [shape: f32[8,1], index: 3, kind: input, shape index: {}]   ;;  %s323_s4 = inlined_call_operand.vmem [shape: f32[1,128], index: 4, kind: input, shape index: {}]   ;;  %s324_s5 = inlined_call_operand.hbm [shape: f32[8,128], index: 5, kind: output, shape index: {}]  }
   0x1   :  { %12 = vsyncpa [#allocation5], 0  ;;  %s264_s18 = smov [#allocation3]  }
   0x2   :  { %s22_s19 = sshll.u32 %s264_s18, 4  ;;  %s23_s19 = int_to_ptr.vmem [resolvable:$true] %s22_s19 }
   0x3   :  { %s228_s20 = scalar_lea.vmem %s23_s19, 2048  ;;  %p233_p1 = scmp.lt.s32.totalorder %s23_s19, %s23_s19 }
   0x4   :  { %p229_p0 = scmp.ne.s32.totalorder %s23_s19, %s228_s20  ;;  %p234_p2 = scmp.lt.s32.totalorder %s228_s20, %s228_s20 }
   0x6   :  { %p235_p3 = por %p234_p2, %p233_p1 }
   0x8   :  { %p236_p4 = pnand %p235_p3, %p229_p0 }
   0xa   :  { %239 = shalt.err (!%p236_p4)
}
   0xb   :  { %s265_s21 = smov 128   ;;  %s266_s22 = smov 8  }
   0xc   :  { %28 = dma.hbm_to_vmem [thread:$0]  %s321_s2, 2048, %s23_s19, [#allocation4], %s265_s21, %s265_s21, %s266_s22  }
   0xd   :  { %260 = dma.done.wait [#allocation4], 2048  }
   0xe   :  { %261 = vsyncadd [#allocation4], 4294965248  ;;  %v267_v0 = vmov 0.0   ;;  %vm268_vm0 = vmmov 0   ;;  %v269_v1 = vmov 0   ;;  %v52_v2 = vld [vmem:[#allocation3 + $0x78] sm:$0xff]  ;;  %v141_v27 = vstv %s319_s0 }
   0xf   :  { %177 = vmatprep.subr.mxu0 %v267_v0  ;;  %209 = vmatprep.mubr.msk.f32.mxu0 %vm268_vm0, %v267_v0  ;;  %v51_v3 = vld [vmem:[#allocation3 + $0x70] sm:$0xff]  ;;  %v123_v4 = vld [vmem:[%s322_s3] sm:$0xff]  ;;  %v50_v5 = vld [vmem:[#allocation3 + $0x68] sm:$0xff]  ;;  %s270_s6 = smov [#allocation6]  }
  0x10   :  { %219 = vset.pattern.permute.xlu0 %v269_v1  ;;  %178 = vmatpush3.xpose.msra.mxu0 %v52_v2  ;;  %v49_v6 = vld [vmem:[#allocation3 + $0x60] sm:$0xff]  ;;  %v48_v7 = vld [vmem:[#allocation3 + $0x58] sm:$0xff]  ;;  %v47_v8 = vld [vmem:[#allocation3 + $0x50] sm:$0xff]  ;;  %s150_s7 = sshll.u32 %s270_s6, 4  ;;  %s151_s7 = int_to_ptr.vmem [resolvable:$true] %s150_s7 }
  0x11   :  { %179 = vmatprep.subr.mxu0 %v267_v0  ;;  %127 = vperm.xlu0 %219, %v123_v4   ;;  %v46_v9 = vld [vmem:[#allocation3 + $0x48] sm:$0xff]  ;;  %v45_v10 = vld [vmem:[#allocation3 + $0x40] sm:$0xff]  ;;  %v44_v11 = vld [vmem:[#allocation3 + $0x38] sm:$0xff]  ;;  %p245_p6 = scmp.lt.s32.totalorder %s151_s7, %s151_s7 }
  0x12   :  { %v43_v12 = vld [vmem:[#allocation3 + $0x30] sm:$0xff]  ;;  %v42_v13 = vld [vmem:[#allocation3 + $0x28] sm:$0xff]  ;;  %v41_v14 = vld [vmem:[#allocation3 + $0x20] sm:$0xff] }
  0x13   :  { %v40_v15 = vld [vmem:[#allocation3 + $0x18] sm:$0xff]  ;;  %v39_v16 = vld [vmem:[#allocation3 + $0x10] sm:$0xff]  ;;  %v38_v17 = vld [vmem:[#allocation3 + $0x8] sm:$0xff] }
  0x14   :  { %180 = vmatpush3.xpose.msra.mxu0 %v51_v3  ;;  %v37_v18 = vld [vmem:[#allocation3] sm:$0xff] }
  0x15   :  { %181 = vmatprep.subr.mxu0 %v267_v0  ;;  %v36_v19 = vld [vmem:[%s320_s1] sm:$0xff]  ;;  %s240_s1 = scalar_lea.vmem %s151_s7, 128 }
  0x16   :  { %v159_v20 = vld [vmem:[%s323_s4] ss:$0 sm:$0xff]  ;;  %p241_p5 = scmp.ne.s32.totalorder %s151_s7, %s240_s1  ;;  %p246_p7 = scmp.lt.s32.totalorder %s240_s1, %s240_s1 }
  0x18   :  { %182 = vmatpush3.xpose.msra.mxu0 %v50_v5  ;;  %p247_p8 = por %p246_p7, %p245_p6 }
  0x19   :  { %183 = vmatprep.subr.mxu0 %v267_v0 }
  0x1a   :  { %p248_p9 = pnand %p247_p8, %p241_p5 }
  0x1c   :  { %184 = vmatpush3.xpose.msra.mxu0 %v49_v6 }
  0x1d   :  { %185 = vmatprep.subr.mxu0 %v267_v0 }
  0x20   :  { %186 = vmatpush3.xpose.msra.mxu0 %v48_v7 }
  0x21   :  { %187 = vmatprep.subr.mxu0 %v267_v0 }
  0x24   :  { %188 = vmatpush3.xpose.msra.mxu0 %v47_v8 }
  0x25   :  { %189 = vmatprep.subr.mxu0 %v267_v0 }
  0x28   :  { %190 = vmatpush3.xpose.msra.mxu0 %v46_v9 }
  0x29   :  { %191 = vmatprep.subr.mxu0 %v267_v0 }
  0x2c   :  { %192 = vmatpush3.xpose.msra.mxu0 %v45_v10 }
  0x2d   :  { %193 = vmatprep.subr.mxu0 %v267_v0 }
  0x30   :  { %194 = vmatpush3.xpose.msra.mxu0 %v44_v11 }
  0x31   :  { %195 = vmatprep.subr.mxu0 %v267_v0 }
  0x34   :  { %196 = vmatpush3.xpose.msra.mxu0 %v43_v12 }
  0x35   :  { %197 = vmatprep.subr.mxu0 %v267_v0 }
  0x38   :  { %198 = vmatpush3.xpose.msra.mxu0 %v42_v13 }
  0x39   :  { %199 = vmatprep.subr.mxu0 %v267_v0 }
  0x3c   :  { %200 = vmatpush3.xpose.msra.mxu0 %v41_v14 }
  0x3d   :  { %201 = vmatprep.subr.mxu0 %v267_v0 }
  0x40   :  { %202 = vmatpush3.xpose.msra.mxu0 %v40_v15 }
  0x41   :  { %203 = vmatprep.subr.mxu0 %v267_v0 }
  0x44   :  { %204 = vmatpush3.xpose.msra.mxu0 %v39_v16 }
  0x45   :  { %205 = vmatprep.subr.mxu0 %v267_v0 }
  0x48   :  { %206 = vmatpush3.xpose.msra.mxu0 %v38_v17 }
  0x49   :  { %207 = vmatprep.subr.mxu0 %v267_v0 }
  0x4c   :  { %208 = vmatpush3.xpose.msra.mxu0 %v37_v18 }
  0x4f   :  { %210 = vmatmul.mubr.f32.vlgmr.msra.gmra.mxu0 %v36_v19 }
  0x8c   :  { %v128_v21 = vpop.permute.xlu0 %127 }
  0x8d   :  { %v136_v22 = vadd.f32 %v159_v20, %v128_v21 }
 0x10f   :  { %v119_v23 = vpop.f32.mrf.mxu0 }
 0x110   :  { %v137_v24 = vmul.f32 2.0, %v119_v23 }
 0x111   :  { %v211_v25 = vpop.f32.mrf.mxu0 }
 0x112   :  { %v138_v26 = vsub.f32 %v136_v22, %v137_v24 }
 0x114   :  { %v139_v28 = vmax.f32 %v138_v26, 0.0 }
 0x116   :  { %v142_v29 = vmul.f32 %v141_v27, %v139_v28 }
 0x118   :  { %143 = vst [vmem:[#allocation6] sm:$0xff] %v142_v29 }
 0x119   :  { %251 = shalt.err (!%p248_p9)
}
 0x11a   :  { %153 = dma.vmem_to_hbm [thread:$0]  %s151_s7, 128, %s324_s5, [#allocation5]  }
 0x11b   :  { %262 = dma.done.wait [#allocation5], 128  }
 0x11c   :  { %263 = vsyncadd [#allocation5], 4294967168 }
 0x11d   :  { %157 = vsyncpa [#allocation4], 1 }
 0x11e   :  { %158 = vsyncpa [#allocation5], 1 }

</bundles_post_ra>
